<compile_context>
chip_gen: v7x
topology: tpu7x:2x2x1
jax: 0.10.0
libtpu: 0.0.40
codegen_flags: <defaults>
</compile_context>

<pallas_src>
import functools

import jax
import jax.numpy as jnp
from jax.experimental import pallas as pl
from jax.experimental.pallas import tpu as pltpu


# ----------------------------------------------------------------------------
# Kernel 1: fused LayerNorm + MLP0 + GELU + MLP1 + batch-mean  ->  (C, K*K)
# ----------------------------------------------------------------------------
def compute_attn_weight(x, params):
    B, C, H, W = x.shape
    HW = H * W
    HIDDEN = params["w0"].shape[1]
    KK = params["w1"].shape[1]
    KKP = ((KK + 127) // 128) * 128          # lane-dense (>=128) padded width

    # C tile: whole C if it fits (toy case C=4); multiples of 128 otherwise.
    C_TILE = C if C <= 128 else 128
    assert C % C_TILE == 0, "C must be divisible by the channel tile"
    n_ct = C // C_TILE

    x3 = x.reshape(B, C, HW).astype(jnp.float32)
    # bf16 only at the MXU boundary; biases / LN params stay f32.
    w0 = params["w0"].astype(jnp.bfloat16)                            # (HW, HIDDEN)
    b0 = params["b0"].astype(jnp.float32)                             # (1, HIDDEN)
    w1 = jnp.pad(params["w1"], ((0, 0), (0, KKP - KK))).astype(jnp.bfloat16)
    b1 = jnp.pad(params["b1"], ((0, 0), (0, KKP - KK))).astype(jnp.float32)
    gamma = params["ln_gamma"].astype(jnp.float32)                    # (1, HW)
    beta = params["ln_beta"].astype(jnp.float32)                      # (1, HW)
    inv_b = 1.0 / B

    def kernel(x_ref, g_ref, beta_ref, w0_ref, b0_ref, w1_ref, b1_ref,
               out_ref, acc_ref):
        b = pl.program_id(1)

        @pl.when(b == 0)
        def _():
            acc_ref[...] = jnp.zeros_like(acc_ref)

        xv = x_ref[0]                                         # (C_TILE, HW) f32
        mean = jnp.mean(xv, axis=-1, keepdims=True)
        var = jnp.mean((xv - mean) ** 2, axis=-1, keepdims=True)
        xn = (xv - mean) * jax.lax.rsqrt(var + 1e-5)          # torch LN eps
        xn = xn * g_ref[...] + beta_ref[...]

        h = jnp.dot(xn.astype(jnp.bfloat16), w0_ref[...],
                    preferred_element_type=jnp.float32) + b0_ref[...]
        # TODO(synk): torch nn.GELU() is exact erf GELU; tanh approximation used.
        h = jax.nn.gelu(h, approximate=True)
        # Dropout(p=0.2) is identity in eval mode.
        a = jnp.dot(h.astype(jnp.bfloat16), w1_ref[...],
                    preferred_element_type=jnp.float32) + b1_ref[...]

        acc_ref[...] += a                                     # batch-mean accum

        @pl.when(b == pl.num_programs(1) - 1)
        def _():
            out_ref[...] = acc_ref[...] * inv_b

    out = pl.pallas_call(
        kernel,
        out_shape=jax.ShapeDtypeStruct((C, KKP), jnp.float32),
        grid=(n_ct, B),                       # C-tiles parallel, B = reduction
        in_specs=[
            pl.BlockSpec((1, C_TILE, HW), lambda ci, b: (b, ci, 0)),  # x rows
            pl.BlockSpec((1, HW), lambda ci, b: (0, 0)),              # ln gamma
            pl.BlockSpec((1, HW), lambda ci, b: (0, 0)),              # ln beta
            pl.BlockSpec((HW, HIDDEN), lambda ci, b: (0, 0)),         # w0 (bf16)
            pl.BlockSpec((1, HIDDEN), lambda ci, b: (0, 0)),          # b0
            pl.BlockSpec((HIDDEN, KKP), lambda ci, b: (0, 0)),        # w1 (bf16)
            pl.BlockSpec((1, KKP), lambda ci, b: (0, 0)),             # b1
        ],
        out_specs=pl.BlockSpec((C_TILE, KKP), lambda ci, b: (ci, 0)),
        scratch_shapes=[pltpu.VMEM((C_TILE, KKP), jnp.float32)],
        compiler_params=pltpu.CompilerParams(
            dimension_semantics=("parallel", "arbitrary"),
            vmem_limit_bytes=32 * 1024 * 1024),
    )(x3, gamma, beta, w0, b0, w1, b1)
    return out[:, :KK]                        # slice the lane padding back off


# ----------------------------------------------------------------------------
# Kernel 2: depthwise conv2d (groups=C, stride=1, padding=K//2) + bias
# Flattened-spatial layout: (B, C, H*W) so lanes are dense; halo handled by
# zero-fill lane shifts + precomputed column masks (no padded HBM copy of x).
# ----------------------------------------------------------------------------
def depthwise_conv(x, weight, bias, kernel_size):
    B, C, H, W = x.shape
    K = kernel_size
    pad = K // 2
    HW = H * W
    x3 = x.reshape(B, C, HW)                                  # free reshape

    # Per-kw column-validity masks, (K, HW) f32, tiny & resident in VMEM.
    col = jnp.arange(HW, dtype=jnp.int32) % W
    masks = jnp.stack(
        [((col + (kw - pad) >= 0) & (col + (kw - pad) < W)).astype(jnp.float32)
         for kw in range(K)], axis=0)
    w = weight.astype(jnp.float32)                            # (C, K*K)
    b2 = bias.reshape(C, 1).astype(jnp.float32)               # (C, 1)

    def kernel(w_ref, b_ref, m_ref, x_ref, o_ref):
        xv = x_ref[0]                                         # (C, HW) f32
        acc = jnp.zeros((C, HW), jnp.float32)
        for kh in range(K):
            for kw in range(K):
                s = (kh - pad) * W + (kw - pad)               # flat-index shift
                if s > 0:
                    sh = jnp.concatenate(
                        [xv[:, s:], jnp.zeros((C, s), jnp.float32)], axis=1)
                elif s < 0:
                    sh = jnp.concatenate(
                        [jnp.zeros((C, -s), jnp.float32), xv[:, :HW + s]], axis=1)
                else:
                    sh = xv
                if kw != pad:                                 # column halo mask
                    sh = sh * m_ref[kw:kw + 1, :]
                j = kh * K + kw
                acc = acc + sh * w_ref[:, j:j + 1]            # (C,1) bcast tap
        o_ref[0] = (acc + b_ref[...]).astype(o_ref.dtype)

    out = pl.pallas_call(
        kernel,
        out_shape=jax.ShapeDtypeStruct((B, C, HW), x.dtype),
        grid=(B,),                                            # whole image/step
        in_specs=[
            pl.BlockSpec((C, K * K), lambda b: (0, 0)),       # filters (VMEM)
            pl.BlockSpec((C, 1), lambda b: (0, 0)),           # bias (VMEM)
            pl.BlockSpec((K, HW), lambda b: (0, 0)),          # column masks
            pl.BlockSpec((1, C, HW), lambda b: (b, 0, 0)),    # x image
        ],
        out_specs=pl.BlockSpec((1, C, HW), lambda b: (b, 0, 0)),
        compiler_params=pltpu.CompilerParams(
            dimension_semantics=("parallel",),
            vmem_limit_bytes=32 * 1024 * 1024),
    )(w, b2, masks, x3)
    return out.reshape(B, C, H, W)


# ----------------------------------------------------------------------------
# Module wrapper
# ----------------------------------------------------------------------------
def self_dwconv_forward(x, params, *, kernel_size, compute_out=True):
    """SelfDWConv pipeline. Returns (y, out) where y == x (the PyTorch module
    returns the input unchanged); `out` is the internally-computed depthwise
    conv result (discarded by the module).  compute_out=False skips the dead
    compute entirely."""
    if not compute_out:
        return x, None
    attn_w = compute_attn_weight(x, params)                   # (C, K*K)
    out = depthwise_conv(x, attn_w, params["attn_bias"], kernel_size)
    return x, out


def init_params(key, channel, height, width, kernel_size, hidden_dim):
    HW = height * width
    KK = kernel_size * kernel_size
    k0, k1, k2, k3 = jax.random.split(key, 4)

    def lin_init(k, fan_in, shape):
        bound = 1.0 / float(fan_in) ** 0.5
        return jax.random.uniform(k, shape, jnp.float32, -bound, bound)

    return dict(
        ln_gamma=jnp.ones((1, HW), jnp.float32),     # nn.LayerNorm default
        ln_beta=jnp.zeros((1, HW), jnp.float32),
        w0=lin_init(k0, HW, (HW, hidden_dim)),       # mlp0 (stored in->out)
        b0=lin_init(k1, HW, (1, hidden_dim)),
        w1=lin_init(k2, hidden_dim, (hidden_dim, KK)),
        b1=lin_init(k3, hidden_dim, (1, KK)),
        attn_bias=jnp.zeros((channel,), jnp.float32),  # nn.Parameter(zeros(C))
    )


if __name__ == "__main__":
    B, C, H, W = 2, 4, 16, 16
    KERNEL_SIZE, HIDDEN = 3, 32

    key = jax.random.PRNGKey(0)
    kx, kp = jax.random.split(key)
    x = jax.random.normal(kx, (B, C, H, W), jnp.float32)
    params = init_params(kp, C, H, W, KERNEL_SIZE, HIDDEN)

    fwd = jax.jit(functools.partial(self_dwconv_forward, kernel_size=KERNEL_SIZE))
    y, out = fwd(x, params)
    jax.block_until_ready((y, out))

    assert y.shape == (B, C, H, W)
    assert out.shape == (B, C, H, W)
    # PyTorch forward() returns the input unchanged.
    assert bool(jnp.allclose(y, x))
    assert bool(jnp.all(jnp.isfinite(out)))

    print("KERNEL_OK")
</pallas_src>

<mosaic_0001>
module attributes {stable_mosaic.version = 11 : i64} {
  func.func @kernel(%arg0: i32, %arg1: i32, %arg2: memref<1x4x256xf32, #tpu.memory_space<vmem>>, %arg3: memref<1x256xf32, #tpu.memory_space<vmem>>, %arg4: memref<1x256xf32, #tpu.memory_space<vmem>>, %arg5: memref<256x32xbf16, #tpu.memory_space<vmem>>, %arg6: memref<1x32xf32, #tpu.memory_space<vmem>>, %arg7: memref<32x128xbf16, #tpu.memory_space<vmem>>, %arg8: memref<1x128xf32, #tpu.memory_space<vmem>>, %arg9: memref<4x128xf32, #tpu.memory_space<vmem>>, %arg10: memref<4x128xf32, #tpu.memory_space<vmem>>) attributes {dimension_semantics = [#tpu.dimension_semantics<parallel>, #tpu.dimension_semantics<arbitrary>], iteration_bounds = array<i64: 1, 2>, scalar_prefetch = 0 : i64, scratch_operands = 1 : i64, tpu.core_type = #tpu.core_type<tc>, window_params = [{transform_indices = @transform_0, window_bounds = array<i64: 1, 4, 256>}, {pipeline_mode = #tpu.pipeline_mode<synchronous>, transform_indices = @transform_1, window_bounds = array<i64: 1, 256>}, {pipeline_mode = #tpu.pipeline_mode<synchronous>, transform_indices = @transform_2, window_bounds = array<i64: 1, 256>}, {pipeline_mode = #tpu.pipeline_mode<synchronous>, transform_indices = @transform_3, window_bounds = array<i64: 256, 32>}, {pipeline_mode = #tpu.pipeline_mode<synchronous>, transform_indices = @transform_4, window_bounds = array<i64: 1, 32>}, {pipeline_mode = #tpu.pipeline_mode<synchronous>, transform_indices = @transform_5, window_bounds = array<i64: 32, 128>}, {pipeline_mode = #tpu.pipeline_mode<synchronous>, transform_indices = @transform_6, window_bounds = array<i64: 1, 128>}, {transform_indices = @transform_7, window_bounds = array<i64: 4, 128>}]} {
    %c0_i32 = arith.constant 0 : i32
    %0 = arith.cmpi eq, %arg1, %c0_i32 : i32
    %1 = arith.extui %0 : i1 to i32
    %c0_i32_0 = arith.constant 0 : i32
    %2 = arith.cmpi ne, %1, %c0_i32_0 : i32
    scf.if %2 {
      %cst_30 = arith.constant 0.000000e+00 : f32
      %60 = vector.broadcast %cst_30 : f32 to vector<4x128xf32>
      %c0_31 = arith.constant 0 : index
      %c0_32 = arith.constant 0 : index
      %61 = vector.load %arg10[%c0_31, %c0_32] : memref<4x128xf32, #tpu.memory_space<vmem>>, vector<4x128xf32>
      tpu.vector_store %arg10[%c0_31, %c0_32], %60 {strides = array<i32>} : memref<4x128xf32, #tpu.memory_space<vmem>>, vector<4x128xf32>,
    } else {
    }
    %c0 = arith.constant 0 : index
    %c0_1 = arith.constant 0 : index
    %c0_2 = arith.constant 0 : index
    %3 = vector.load %arg2[%c0, %c0_1, %c0_2] : memref<1x4x256xf32, #tpu.memory_space<vmem>>, vector<1x4x256xf32>
    %4 = vector.shape_cast %3 : vector<1x4x256xf32> to vector<4x256xf32>
    %cst = arith.constant dense<0.000000e+00> : vector<4xf32>
    %5 = vector.multi_reduction <add>, %4, %cst [1] : vector<4x256xf32> to vector<4xf32>
    %6 = vector.shape_cast %5 : vector<4xf32> to vector<4x1xf32>
    %cst_3 = arith.constant 2.560000e+02 : f32
    %7 = vector.broadcast %cst_3 : f32 to vector<4x1xf32>
    %8 = arith.divf %6, %7 : vector<4x1xf32>
    %9 = vector.broadcast %8 : vector<4x1xf32> to vector<4x256xf32>
    %10 = arith.subf %4, %9 : vector<4x256xf32>
    %11 = arith.mulf %10, %10 : vector<4x256xf32>
    %cst_4 = arith.constant dense<0.000000e+00> : vector<4xf32>
    %12 = vector.multi_reduction <add>, %11, %cst_4 [1] : vector<4x256xf32> to vector<4xf32>
    %13 = vector.shape_cast %12 : vector<4xf32> to vector<4x1xf32>
    %cst_5 = arith.constant 2.560000e+02 : f32
    %14 = vector.broadcast %cst_5 : f32 to vector<4x1xf32>
    %15 = arith.divf %13, %14 : vector<4x1xf32>
    %16 = vector.broadcast %8 : vector<4x1xf32> to vector<4x256xf32>
    %17 = arith.subf %4, %16 : vector<4x256xf32>
    %cst_6 = arith.constant 9.99999974E-6 : f32
    %18 = vector.broadcast %cst_6 : f32 to vector<4x1xf32>
    %19 = arith.addf %15, %18 : vector<4x1xf32>
    %20 = math.rsqrt %19 : vector<4x1xf32>
    %21 = vector.broadcast %20 : vector<4x1xf32> to vector<4x256xf32>
    %22 = arith.mulf %17, %21 : vector<4x256xf32>
    %c0_7 = arith.constant 0 : index
    %c0_8 = arith.constant 0 : index
    %23 = vector.load %arg3[%c0_7, %c0_8] : memref<1x256xf32, #tpu.memory_space<vmem>>, vector<1x256xf32>
    %24 = vector.broadcast %23 : vector<1x256xf32> to vector<4x256xf32>
    %25 = arith.mulf %22, %24 : vector<4x256xf32>
    %c0_9 = arith.constant 0 : index
    %c0_10 = arith.constant 0 : index
    %26 = vector.load %arg4[%c0_9, %c0_10] : memref<1x256xf32, #tpu.memory_space<vmem>>, vector<1x256xf32>
    %27 = vector.broadcast %26 : vector<1x256xf32> to vector<4x256xf32>
    %28 = arith.addf %25, %27 : vector<4x256xf32>
    %29 = arith.truncf %28 : vector<4x256xf32> to vector<4x256xbf16>
    %c0_11 = arith.constant 0 : index
    %c0_12 = arith.constant 0 : index
    %30 = vector.load %arg5[%c0_11, %c0_12] : memref<256x32xbf16, #tpu.memory_space<vmem>>, vector<256x32xbf16>
    %cst_13 = arith.constant dense<0.000000e+00> : vector<4x32xf32>
    %31 = tpu.matmul %29, %30, %cst_13 {dimension_numbers = #tpu.dot_dimension_numbers<[1], [0], [0], [1], [0, 0, 1, 1], [], []>} : vector<4x256xbf16>, vector<256x32xbf16>, vector<4x32xf32> -> vector<4x32xf32>
    %c0_14 = arith.constant 0 : index
    %c0_15 = arith.constant 0 : index
    %32 = vector.load %arg6[%c0_14, %c0_15] : memref<1x32xf32, #tpu.memory_space<vmem>>, vector<1x32xf32>
    %33 = vector.broadcast %32 : vector<1x32xf32> to vector<4x32xf32>
    %34 = arith.addf %31, %33 : vector<4x32xf32>
    %35 = arith.mulf %34, %34 : vector<4x32xf32>
    %36 = arith.mulf %34, %35 : vector<4x32xf32>
    %cst_16 = arith.constant 4.471500e-02 : f32
    %37 = vector.broadcast %cst_16 : f32 to vector<4x32xf32>
    %38 = arith.mulf %37, %36 : vector<4x32xf32>
    %39 = arith.addf %34, %38 : vector<4x32xf32>
    %cst_17 = arith.constant 0.797884583 : f32
    %40 = vector.broadcast %cst_17 : f32 to vector<4x32xf32>
    %41 = arith.mulf %40, %39 : vector<4x32xf32>
    %42 = math.tanh %41 : vector<4x32xf32>
    %cst_18 = arith.constant 1.000000e+00 : f32
    %43 = vector.broadcast %cst_18 : f32 to vector<4x32xf32>
    %44 = arith.addf %43, %42 : vector<4x32xf32>
    %cst_19 = arith.constant 5.000000e-01 : f32
    %45 = vector.broadcast %cst_19 : f32 to vector<4x32xf32>
    %46 = arith.mulf %45, %44 : vector<4x32xf32>
    %47 = arith.mulf %34, %46 : vector<4x32xf32>
    %48 = arith.truncf %47 : vector<4x32xf32> to vector<4x32xbf16>
    %c0_20 = arith.constant 0 : index
    %c0_21 = arith.constant 0 : index
    %49 = vector.load %arg7[%c0_20, %c0_21] : memref<32x128xbf16, #tpu.memory_space<vmem>>, vector<32x128xbf16>
    %cst_22 = arith.constant dense<0.000000e+00> : vector<4x128xf32>
    %50 = tpu.matmul %48, %49, %cst_22 {dimension_numbers = #tpu.dot_dimension_numbers<[1], [0], [0], [1], [0, 0, 1, 1], [], []>} : vector<4x32xbf16>, vector<32x128xbf16>, vector<4x128xf32> -> vector<4x128xf32>
    %c0_23 = arith.constant 0 : index
    %c0_24 = arith.constant 0 : index
    %51 = vector.load %arg8[%c0_23, %c0_24] : memref<1x128xf32, #tpu.memory_space<vmem>>, vector<1x128xf32>
    %52 = vector.broadcast %51 : vector<1x128xf32> to vector<4x128xf32>
    %53 = arith.addf %50, %52 : vector<4x128xf32>
    %c0_25 = arith.constant 0 : index
    %c0_26 = arith.constant 0 : index
    %54 = vector.load %arg10[%c0_25, %c0_26] : memref<4x128xf32, #tpu.memory_space<vmem>>, vector<4x128xf32>
    %55 = arith.addf %54, %53 : vector<4x128xf32>
    %c0_27 = arith.constant 0 : index
    %c0_28 = arith.constant 0 : index
    %56 = vector.load %arg10[%c0_27, %c0_28] : memref<4x128xf32, #tpu.memory_space<vmem>>, vector<4x128xf32>
    tpu.vector_store %arg10[%c0_27, %c0_28], %55 {strides = array<i32>} : memref<4x128xf32, #tpu.memory_space<vmem>>, vector<4x128xf32>,
    %c1_i32 = arith.constant 1 : i32
    %57 = arith.cmpi eq, %arg1, %c1_i32 : i32
    %58 = arith.extui %57 : i1 to i32
    %c0_i32_29 = arith.constant 0 : i32
    %59 = arith.cmpi ne, %58, %c0_i32_29 : i32
    scf.if %59 {
      %c0_30 = arith.constant 0 : index
      %c0_31 = arith.constant 0 : index
      %60 = vector.load %arg10[%c0_30, %c0_31] : memref<4x128xf32, #tpu.memory_space<vmem>>, vector<4x128xf32>
      %cst_32 = arith.constant 5.000000e-01 : f32
      %61 = vector.broadcast %cst_32 : f32 to vector<4x128xf32>
      %62 = arith.mulf %60, %61 : vector<4x128xf32>
      %c0_33 = arith.constant 0 : index
      %c0_34 = arith.constant 0 : index
      %63 = vector.load %arg9[%c0_33, %c0_34] : memref<4x128xf32, #tpu.memory_space<vmem>>, vector<4x128xf32>
      tpu.vector_store %arg9[%c0_33, %c0_34], %62 {strides = array<i32>} : memref<4x128xf32, #tpu.memory_space<vmem>>, vector<4x128xf32>,
    } else {
    }
    return
  }
  func.func @transform_0(%arg0: i32, %arg1: i32) -> (i32, i32, i32) {
    %c0_i32 = arith.constant 0 : i32
    %c0_i32_0 = arith.constant 0 : i32
    return %arg1, %arg0, %c0_i32 : i32, i32, i32
  }
  func.func @transform_1(%arg0: i32, %arg1: i32) -> (i32, i32) {
    %c0_i32 = arith.constant 0 : i32
    %c0_i32_0 = arith.constant 0 : i32
    %c0_i32_1 = arith.constant 0 : i32
    return %c0_i32, %c0_i32_0 : i32, i32
  }
  func.func @transform_2(%arg0: i32, %arg1: i32) -> (i32, i32) {
    %c0_i32 = arith.constant 0 : i32
    %c0_i32_0 = arith.constant 0 : i32
    %c0_i32_1 = arith.constant 0 : i32
    return %c0_i32, %c0_i32_0 : i32, i32
  }
  func.func @transform_3(%arg0: i32, %arg1: i32) -> (i32, i32) {
    %c0_i32 = arith.constant 0 : i32
    %c0_i32_0 = arith.constant 0 : i32
    %c0_i32_1 = arith.constant 0 : i32
    return %c0_i32, %c0_i32_0 : i32, i32
  }
  func.func @transform_4(%arg0: i32, %arg1: i32) -> (i32, i32) {
    %c0_i32 = arith.constant 0 : i32
    %c0_i32_0 = arith.constant 0 : i32
    %c0_i32_1 = arith.constant 0 : i32
    return %c0_i32, %c0_i32_0 : i32, i32
  }
  func.func @transform_5(%arg0: i32, %arg1: i32) -> (i32, i32) {
    %c0_i32 = arith.constant 0 : i32
    %c0_i32_0 = arith.constant 0 : i32
    %c0_i32_1 = arith.constant 0 : i32
    return %c0_i32, %c0_i32_0 : i32, i32
  }
  func.func @transform_6(%arg0: i32, %arg1: i32) -> (i32, i32) {
    %c0_i32 = arith.constant 0 : i32
    %c0_i32_0 = arith.constant 0 : i32
    %c0_i32_1 = arith.constant 0 : i32
    return %c0_i32, %c0_i32_0 : i32, i32
  }
  func.func @transform_7(%arg0: i32, %arg1: i32) -> (i32, i32) {
    %c0_i32 = arith.constant 0 : i32
    %c0_i32_0 = arith.constant 0 : i32
    return %arg0, %c0_i32 : i32, i32
  }
}

module attributes {stable_mosaic.version = 11 : i64} {
  func.func @kernel(%arg0: i32, %arg1: memref<4x9xf32, #tpu.memory_space<vmem>>, %arg2: memref<4x1xf32, #tpu.memory_space<vmem>>, %arg3: memref<3x256xf32, #tpu.memory_space<vmem>>, %arg4: memref<1x4x256xf32, #tpu.memory_space<vmem>>, %arg5: memref<1x4x256xf32, #tpu.memory_space<vmem>>) attributes {dimension_semantics = [#tpu.dimension_semantics<parallel>], iteration_bounds = array<i64: 2>, scalar_prefetch = 0 : i64, scratch_operands = 0 : i64, tpu.core_type = #tpu.core_type<tc>, window_params = [{pipeline_mode = #tpu.pipeline_mode<synchronous>, transform_indices = @transform_0, window_bounds = array<i64: 4, 9>}, {pipeline_mode = #tpu.pipeline_mode<synchronous>, transform_indices = @transform_1, window_bounds = array<i64: 4, 1>}, {pipeline_mode = #tpu.pipeline_mode<synchronous>, transform_indices = @transform_2, window_bounds = array<i64: 3, 256>}, {transform_indices = @transform_3, window_bounds = array<i64: 1, 4, 256>}, {transform_indices = @transform_4, window_bounds = array<i64: 1, 4, 256>}]} {
    %c0 = arith.constant 0 : index
    %c0_0 = arith.constant 0 : index
    %c0_1 = arith.constant 0 : index
    %0 = vector.load %arg4[%c0, %c0_0, %c0_1] : memref<1x4x256xf32, #tpu.memory_space<vmem>>, vector<1x4x256xf32>
    %1 = vector.shape_cast %0 : vector<1x4x256xf32> to vector<4x256xf32>
    %cst = arith.constant 0.000000e+00 : f32
    %2 = vector.broadcast %cst : f32 to vector<4x256xf32>
    %cst_2 = arith.constant 0.000000e+00 : f32
    %3 = vector.broadcast %cst_2 : f32 to vector<4x17xf32>
    %4 = vector.extract_strided_slice %1 {offsets = [0, 0], sizes = [4, 239], strides = [1, 1]} : vector<4x256xf32> to vector<4x239xf32>
    %5 = tpu.concatenate %3, %4 in 1 : vector<4x17xf32>, vector<4x239xf32> -> vector<4x256xf32>
    %c0_3 = arith.constant 0 : index
    %c0_4 = arith.constant 0 : index
    %6 = vector.load %arg3[%c0_3, %c0_4] : memref<3x256xf32, #tpu.memory_space<vmem>>, vector<1x256xf32>
    %7 = vector.broadcast %6 : vector<1x256xf32> to vector<4x256xf32>
    %8 = arith.mulf %5, %7 : vector<4x256xf32>
    %c0_5 = arith.constant 0 : index
    %c0_6 = arith.constant 0 : index
    %9 = vector.load %arg1[%c0_5, %c0_6] : memref<4x9xf32, #tpu.memory_space<vmem>>, vector<4x1xf32>
    %10 = vector.broadcast %9 : vector<4x1xf32> to vector<4x256xf32>
    %11 = arith.mulf %8, %10 : vector<4x256xf32>
    %12 = arith.addf %2, %11 : vector<4x256xf32>
    %cst_7 = arith.constant 0.000000e+00 : f32
    %13 = vector.broadcast %cst_7 : f32 to vector<4x16xf32>
    %14 = vector.extract_strided_slice %1 {offsets = [0, 0], sizes = [4, 240], strides = [1, 1]} : vector<4x256xf32> to vector<4x240xf32>
    %15 = tpu.concatenate %13, %14 in 1 : vector<4x16xf32>, vector<4x240xf32> -> vector<4x256xf32>
    %c0_8 = arith.constant 0 : index
    %c1 = arith.constant 1 : index
    %16 = vector.load %arg1[%c0_8, %c1] : memref<4x9xf32, #tpu.memory_space<vmem>>, vector<4x1xf32>
    %17 = vector.broadcast %16 : vector<4x1xf32> to vector<4x256xf32>
    %18 = arith.mulf %15, %17 : vector<4x256xf32>
    %19 = arith.addf %12, %18 : vector<4x256xf32>
    %cst_9 = arith.constant 0.000000e+00 : f32
    %20 = vector.broadcast %cst_9 : f32 to vector<4x15xf32>
    %21 = vector.extract_strided_slice %1 {offsets = [0, 0], sizes = [4, 241], strides = [1, 1]} : vector<4x256xf32> to vector<4x241xf32>
    %22 = tpu.concatenate %20, %21 in 1 : vector<4x15xf32>, vector<4x241xf32> -> vector<4x256xf32>
    %c2 = arith.constant 2 : index
    %c0_10 = arith.constant 0 : index
    %23 = vector.load %arg3[%c2, %c0_10] : memref<3x256xf32, #tpu.memory_space<vmem>>, vector<1x256xf32>
    %24 = vector.broadcast %23 : vector<1x256xf32> to vector<4x256xf32>
    %25 = arith.mulf %22, %24 : vector<4x256xf32>
    %c0_11 = arith.constant 0 : index
    %c2_12 = arith.constant 2 : index
    %26 = vector.load %arg1[%c0_11, %c2_12] : memref<4x9xf32, #tpu.memory_space<vmem>>, vector<4x1xf32>
    %27 = vector.broadcast %26 : vector<4x1xf32> to vector<4x256xf32>
    %28 = arith.mulf %25, %27 : vector<4x256xf32>
    %29 = arith.addf %19, %28 : vector<4x256xf32>
    %cst_13 = arith.constant 0.000000e+00 : f32
    %30 = vector.broadcast %cst_13 : f32 to vector<4x1xf32>
    %31 = vector.extract_strided_slice %1 {offsets = [0, 0], sizes = [4, 255], strides = [1, 1]} : vector<4x256xf32> to vector<4x255xf32>
    %32 = tpu.concatenate %30, %31 in 1 : vector<4x1xf32>, vector<4x255xf32> -> vector<4x256xf32>
    %c0_14 = arith.constant 0 : index
    %c0_15 = arith.constant 0 : index
    %33 = vector.load %arg3[%c0_14, %c0_15] : memref<3x256xf32, #tpu.memory_space<vmem>>, vector<1x256xf32>
    %34 = vector.broadcast %33 : vector<1x256xf32> to vector<4x256xf32>
    %35 = arith.mulf %32, %34 : vector<4x256xf32>
    %c0_16 = arith.constant 0 : index
    %c3 = arith.constant 3 : index
    %36 = vector.load %arg1[%c0_16, %c3] : memref<4x9xf32, #tpu.memory_space<vmem>>, vector<4x1xf32>
    %37 = vector.broadcast %36 : vector<4x1xf32> to vector<4x256xf32>
    %38 = arith.mulf %35, %37 : vector<4x256xf32>
    %39 = arith.addf %29, %38 : vector<4x256xf32>
    %c0_17 = arith.constant 0 : index
    %c4 = arith.constant 4 : index
    %40 = vector.load %arg1[%c0_17, %c4] : memref<4x9xf32, #tpu.memory_space<vmem>>, vector<4x1xf32>
    %41 = vector.broadcast %40 : vector<4x1xf32> to vector<4x256xf32>
    %42 = arith.mulf %1, %41 : vector<4x256xf32>
    %43 = arith.addf %39, %42 : vector<4x256xf32>
    %44 = vector.extract_strided_slice %1 {offsets = [0, 1], sizes = [4, 255], strides = [1, 1]} : vector<4x256xf32> to vector<4x255xf32>
    %cst_18 = arith.constant 0.000000e+00 : f32
    %45 = vector.broadcast %cst_18 : f32 to vector<4x1xf32>
    %46 = tpu.concatenate %44, %45 in 1 : vector<4x255xf32>, vector<4x1xf32> -> vector<4x256xf32>
    %c2_19 = arith.constant 2 : index
    %c0_20 = arith.constant 0 : index
    %47 = vector.load %arg3[%c2_19, %c0_20] : memref<3x256xf32, #tpu.memory_space<vmem>>, vector<1x256xf32>
    %48 = vector.broadcast %47 : vector<1x256xf32> to vector<4x256xf32>
    %49 = arith.mulf %46, %48 : vector<4x256xf32>
    %c0_21 = arith.constant 0 : index
    %c5 = arith.constant 5 : index
    %50 = vector.load %arg1[%c0_21, %c5] : memref<4x9xf32, #tpu.memory_space<vmem>>, vector<4x1xf32>
    %51 = vector.broadcast %50 : vector<4x1xf32> to vector<4x256xf32>
    %52 = arith.mulf %49, %51 : vector<4x256xf32>
    %53 = arith.addf %43, %52 : vector<4x256xf32>
    %54 = vector.extract_strided_slice %1 {offsets = [0, 15], sizes = [4, 241], strides = [1, 1]} : vector<4x256xf32> to vector<4x241xf32>
    %cst_22 = arith.constant 0.000000e+00 : f32
    %55 = vector.broadcast %cst_22 : f32 to vector<4x15xf32>
    %56 = tpu.concatenate %54, %55 in 1 : vector<4x241xf32>, vector<4x15xf32> -> vector<4x256xf32>
    %c0_23 = arith.constant 0 : index
    %c0_24 = arith.constant 0 : index
    %57 = vector.load %arg3[%c0_23, %c0_24] : memref<3x256xf32, #tpu.memory_space<vmem>>, vector<1x256xf32>
    %58 = vector.broadcast %57 : vector<1x256xf32> to vector<4x256xf32>
    %59 = arith.mulf %56, %58 : vector<4x256xf32>
    %c0_25 = arith.constant 0 : index
    %c6 = arith.constant 6 : index
    %60 = vector.load %arg1[%c0_25, %c6] : memref<4x9xf32, #tpu.memory_space<vmem>>, vector<4x1xf32>
    %61 = vector.broadcast %60 : vector<4x1xf32> to vector<4x256xf32>
    %62 = arith.mulf %59, %61 : vector<4x256xf32>
    %63 = arith.addf %53, %62 : vector<4x256xf32>
    %64 = vector.extract_strided_slice %1 {offsets = [0, 16], sizes = [4, 240], strides = [1, 1]} : vector<4x256xf32> to vector<4x240xf32>
    %cst_26 = arith.constant 0.000000e+00 : f32
    %65 = vector.broadcast %cst_26 : f32 to vector<4x16xf32>
    %66 = tpu.concatenate %64, %65 in 1 : vector<4x240xf32>, vector<4x16xf32> -> vector<4x256xf32>
    %c0_27 = arith.constant 0 : index
    %c7 = arith.constant 7 : index
    %67 = vector.load %arg1[%c0_27, %c7] : memref<4x9xf32, #tpu.memory_space<vmem>>, vector<4x1xf32>
    %68 = vector.broadcast %67 : vector<4x1xf32> to vector<4x256xf32>
    %69 = arith.mulf %66, %68 : vector<4x256xf32>
    %70 = arith.addf %63, %69 : vector<4x256xf32>
    %71 = vector.extract_strided_slice %1 {offsets = [0, 17], sizes = [4, 239], strides = [1, 1]} : vector<4x256xf32> to vector<4x239xf32>
    %cst_28 = arith.constant 0.000000e+00 : f32
    %72 = vector.broadcast %cst_28 : f32 to vector<4x17xf32>
    %73 = tpu.concatenate %71, %72 in 1 : vector<4x239xf32>, vector<4x17xf32> -> vector<4x256xf32>
    %c2_29 = arith.constant 2 : index
    %c0_30 = arith.constant 0 : index
    %74 = vector.load %arg3[%c2_29, %c0_30] : memref<3x256xf32, #tpu.memory_space<vmem>>, vector<1x256xf32>
    %75 = vector.broadcast %74 : vector<1x256xf32> to vector<4x256xf32>
    %76 = arith.mulf %73, %75 : vector<4x256xf32>
    %c0_31 = arith.constant 0 : index
    %c8 = arith.constant 8 : index
    %77 = vector.load %arg1[%c0_31, %c8] : memref<4x9xf32, #tpu.memory_space<vmem>>, vector<4x1xf32>
    %78 = vector.broadcast %77 : vector<4x1xf32> to vector<4x256xf32>
    %79 = arith.mulf %76, %78 : vector<4x256xf32>
    %80 = arith.addf %70, %79 : vector<4x256xf32>
    %c0_32 = arith.constant 0 : index
    %c0_33 = arith.constant 0 : index
    %81 = vector.load %arg2[%c0_32, %c0_33] : memref<4x1xf32, #tpu.memory_space<vmem>>, vector<4x1xf32>
    %82 = vector.broadcast %81 : vector<4x1xf32> to vector<4x256xf32>
    %83 = arith.addf %80, %82 : vector<4x256xf32>
    %c0_34 = arith.constant 0 : index
    %c0_35 = arith.constant 0 : index
    %c0_36 = arith.constant 0 : index
    %84 = vector.load %arg5[%c0_34, %c0_35, %c0_36] : memref<1x4x256xf32, #tpu.memory_space<vmem>>, vector<1x4x256xf32>
    %85 = vector.shape_cast %84 : vector<1x4x256xf32> to vector<4x256xf32>
    %86 = vector.shape_cast %83 : vector<4x256xf32> to vector<1x4x256xf32>
    tpu.vector_store %arg5[%c0_34, %c0_35, %c0_36], %86 {strides = array<i32>} : memref<1x4x256xf32, #tpu.memory_space<vmem>>, vector<1x4x256xf32>,
    return
  }
  func.func @transform_0(%arg0: i32) -> (i32, i32) {
    %c0_i32 = arith.constant 0 : i32
    %c0_i32_0 = arith.constant 0 : i32
    %c0_i32_1 = arith.constant 0 : i32
    return %c0_i32, %c0_i32_0 : i32, i32
  }
  func.func @transform_1(%arg0: i32) -> (i32, i32) {
    %c0_i32 = arith.constant 0 : i32
    %c0_i32_0 = arith.constant 0 : i32
    %c0_i32_1 = arith.constant 0 : i32
    return %c0_i32, %c0_i32_0 : i32, i32
  }
  func.func @transform_2(%arg0: i32) -> (i32, i32) {
    %c0_i32 = arith.constant 0 : i32
    %c0_i32_0 = arith.constant 0 : i32
    %c0_i32_1 = arith.constant 0 : i32
    return %c0_i32, %c0_i32_0 : i32, i32
  }
  func.func @transform_3(%arg0: i32) -> (i32, i32, i32) {
    %c0_i32 = arith.constant 0 : i32
    %c0_i32_0 = arith.constant 0 : i32
    %c0_i32_1 = arith.constant 0 : i32
    return %arg0, %c0_i32, %c0_i32_0 : i32, i32, i32
  }
  func.func @transform_4(%arg0: i32) -> (i32, i32, i32) {
    %c0_i32 = arith.constant 0 : i32
    %c0_i32_0 = arith.constant 0 : i32
    %c0_i32_1 = arith.constant 0 : i32
    return %arg0, %c0_i32, %c0_i32_0 : i32, i32, i32
  }
}

</mosaic_0001>

<bundles_post_ra>
// kernel: self_dwconv_forward.3
= control target key start
LH: loop header
LB: loop body
LE: loop exit
PB: predicated region body
PF: predicated region fallthrough
CT: control target
= control target key end

     0   :  { %s577_s15 = smov 0   ;;  %s666_s0 = inlined_call_operand.vmem [shape: f32[4,9], index: 0, kind: input, shape index: {}]   ;;  %s667_s1 = inlined_call_operand.vmem [shape: f32[4,1], index: 1, kind: input, shape index: {}]   ;;  %s668_s2 = inlined_call_operand.vmem [shape: f32[3,256], index: 2, kind: input, shape index: {}]   ;;  %s669_s3 = inlined_call_operand.vmem [shape: f32[2,4,256], index: 3, kind: input, shape index: {}]   ;;  %s670_s4 = inlined_call_operand.vmem [shape: f32[2,4,256], index: 4, kind: output, shape index: {}]  }
   0x1 LB: > { %s475_s16 = sadd.s32 4294967295, %s532_s15   ;;  %p479_p0 = scmp.ge.s32.totalorder %s532_s15, 1  ;;  %s532_s15 = sphi %s577_s15, %s14_s15  }
   0x2   : > { %p162_p1 = scmp.lt.s32.totalorder %s532_s15, 3 }
   0x4   : > { %p163_p2 = pnand %p479_p0, %p162_p1 }
   0x5   : > { %v277_v0 = vld [vmem:[%s666_s0] sm:$0xf] (!%p163_p2)  ;;  %v534_v2 = vmov (!%p163_p2), 2   ;;  %v535_v3 = vmov (!%p163_p2), 0   ;;  %p188_p3 = scmp.lt.s32.totalorder (!%p163_p2), %s475_s16, 1  ;;  %v536_v6 = vmov (!%p163_p2), 4   ;;  %v212_v30 = vlaneseq (!%p163_p2) }
   0x6   : > { %166 = sbr.rel (%p163_p2) target bundleno = 201 (0xc9), region = 36  ;;  %v224_v1 = vld [vmem:[%s666_s0] sm:$0xf] (!%p163_p2)  ;;  %517 = vset.pattern.permute.xlu1 (!%p163_p2), %v534_v2  ;;  %515 = vset.pattern.permute.xlu0 (!%p163_p2), %v535_v3  ;;  %v537_v7 = vmov (!%p163_p2), 1   ;;  %s538_s29 = smov (!%p163_p2), 17   ;;  %v539_v10 = vmov (!%p163_p2), 3  }
   0x7   : > { %280 = vperm.xlu1 (!%p163_p2), %517, %v277_v0   ;;  %227 = vperm.xlu0 (!%p163_p2), %515, %v224_v1   ;;  %v298_v4 = vld [vmem:[%s666_s0] sm:$0xf] (!%p163_p2)  ;;  %v540_v11 = vmov (!%p163_p2), 5   ;;  %s541_s30 = smov (!%p163_p2), 16   ;;  %s542_s5 = smov (!%p163_p2), 15   ;;  %v543_v12 = vmov (!%p163_p2), 6  }
   0x8   : > { %v243_v5 = vld [vmem:[%s666_s0] sm:$0xf] (!%p163_p2)  ;;  %s544_s6 = smov (!%p163_p2), 1   ;;  %s545_s11 = smov (!%p163_p2), 127   ;;  %v546_v15 = vmov (!%p163_p2), 8   ;;  %v548_v16 = vmov (!%p163_p2), 7  }
   0x9   : > { %v336_v13 = vld [vmem:[%s666_s0] sm:$0xf] (!%p163_p2)  ;;  %s547_s12 = smov (!%p163_p2), 113   ;;  %s549_s19 = smov (!%p163_p2), 111   ;;  %v551_v32 = vmov (!%p163_p2), 839922192  }
   0xa   : > { %v357_v14 = vld [vmem:[%s666_s0] sm:$0xf] (!%p163_p2)  ;;  %s550_s22 = smov (!%p163_p2), 112   ;;  %v312_v33 = vunpack.c.l.s4 (!%p163_p2), %v551_v32  ;;  %v213_v34 = vshrl.u32 (!%p163_p2), %v212_v30, 7  ;;  %vm205_vm0 = vcmask (!%p163_p2), 138240   ;;  %vm257_vm1 = vcmask (!%p163_p2), 121856  }
   0xb   : > { %518 = vset.pattern.permute.xlu1 (!%p163_p2), %v536_v6  ;;  %516 = vset.pattern.permute.xlu0 (!%p163_p2), %v537_v7  ;;  %v376_v17 = vld [vmem:[%s666_s0] sm:$0xf] (!%p163_p2)  ;;  %vm238_vm2 = vcmask (!%p163_p2), 130048   ;;  %vm291_vm3 = vcmask (!%p163_p2), 7168   ;;  %vm329_vm4 = vcmask (!%p163_p2), 1039360   ;;  %vm350_vm5 = vcmask (!%p163_p2), 924672  }
   0xc   : > { %309 = vperm.xlu1 (!%p163_p2), %518, %v298_v4   ;;  %246 = vperm.xlu0 (!%p163_p2), %516, %v243_v5   ;;  %v397_v18 = vld [vmem:[%s666_s0] sm:$0xf] (!%p163_p2)  ;;  %v218_v37 = vsub.s32 (!%p163_p2), 1, %v213_v34  ;;  %v313_v38 = vunpack.c.0.s8 (!%p163_p2), %v312_v33  ;;  %v214_v40 = vsub.s32 (!%p163_p2), 0, %v213_v34  ;;  %vm371_vm6 = vcmask (!%p163_p2), 916480  }
   0xd   : > { %s672_s16 = smov (!%p188_p3, %s475_s16), 1  ;;  %v407_v19 = vld [vmem:[%s667_s1] sm:$0xf]  ;;  %vm390_vm7 = vcmask 908288  }
   0xe   : > { %s487_s25 = sshll.u32 %s672_s16, 3  ;;  %v210_v39 = vld [vmem:[%s668_s2] ss:$4 sm:$0x3]  ;;  %v316_v46 = vsub.s32 %v313_v38, %v213_v34 }
   0xf   : > { %s192_s28 = scalar_lea.vmem %s669_s3, %s487_s25  ;;  %v484_v42 = vld [vmem:[%s668_s2 + $0x2] ss:$4 sm:$0x3]  ;;  %v219_v43 = vrot.slane %v210_v39, %v218_v37  ;;  %v215_v49 = vrot.slane %v210_v39, %v214_v40 }
  0x10   : > { %v605_v8 = vld [vmem:[%s192_s28] sm:$0xff]  ;;  %519 = vset.pattern.permute.xlu1 %v539_v10  ;;  %520 = vset.pattern.permute.xlu0 %v540_v11  ;;  %v642_v44 = vrot.slane %v484_v42, %v218_v37  ;;  %v645_v50 = vrot.slane %v484_v42, %v214_v40 }
  0x11   : > { %v200_v9 = vcombine.high %v605_v8, %v605_v8  ;;  %201 = vrot.lane.b32.xlu1 %v605_v8, %s538_s29 }
  0x13   : > { %203 = vrot.lane.b32.xlu0 %v200_v9, %s538_s29 }
  0x15   : > { %301 = vperm.xlu1 %519, %v298_v4  }
  0x17   : > { %234 = vrot.lane.b32.xlu0 %v605_v8, %s541_s30 }
  0x19   : > { %236 = vrot.lane.b32.xlu1 %v200_v9, %s541_s30  ;;  %s197_s30 = scalar_lea.vmem %s670_s4, %s487_s25 }
  0x1a   : > { %521 = vset.pattern.permute.xlu1 %v543_v12 }
  0x1b   : > { %253 = vrot.lane.b32.xlu0 %v605_v8, %s542_s5 }
  0x1d   : > { %255 = vrot.lane.b32.xlu1 %v200_v9, %s542_s5 }
  0x1f   : > { %287 = vrot.lane.b32.xlu0 %v605_v8, %s544_s6 }
  0x21   : > { %289 = vrot.lane.b32.xlu1 %v200_v9, %s544_s6 }
  0x23   : > { %339 = vperm.xlu0 %520, %v336_v13  }
  0x25   : > { %360 = vperm.xlu1 %521, %v357_v14  }
  0x27   : > { %327 = vrot.lane.b32.xlu0 %v200_v9, %s545_s11 }
  0x28   : > { %523 = vset.pattern.permute.xlu0 %v546_v15 }
  0x29   : > { %325 = vrot.lane.b32.xlu1 %v605_v8, %s545_s11 }
  0x2a   : > { %522 = vset.pattern.permute.xlu1 %v548_v16 }
  0x2b   : > { %346 = vrot.lane.b32.xlu0 %v605_v8, %s547_s12 }
  0x2d   : > { %379 = vperm.xlu1 %522, %v376_v17  }
  0x2f   : > { %400 = vperm.xlu0 %523, %v397_v18  }
  0x31   : > { %348 = vrot.lane.b32.xlu1 %v200_v9, %s547_s12 }
  0x33   : > { %386 = vrot.lane.b32.xlu0 %v605_v8, %s549_s19 }
  0x34   : > { %524 = vset.pattern.permute.xlu0 %v535_v3 }
  0x35   : > { %367 = vrot.lane.b32.xlu1 %v605_v8, %s550_s22 }
  0x37   : > { %410 = vperm.xlu0 %524, %v407_v19  }
  0x39   : > { %369 = vrot.lane.b32.xlu1 %v200_v9, %s550_s22 }
  0x3d   : > { %388 = vrot.lane.b32.xlu1 %v200_v9, %s549_s19 }
  0x86   : > { %v281_v20 = vpop.permute.xlu1 %280  ;;  %v228_v21 = vpop.permute.xlu0 %227 }
  0x8b   : > { %v632_v22 = vpop.permute.xlu1 %309  ;;  %v247_v23 = vpop.permute.xlu0 %246 }
  0x8c   : > { %v317_v2 = vrot.slane %v632_v22, %v316_v46 }
  0x8e   : > { %v319_v15 = vmul.f32 %v317_v2, %v605_v8 }
  0x8f   : > { %v202_v24 = vpop.permute.xlu1 %201  ;;  %v204_v25 = vpop.permute.xlu0 %203 }
  0x90   : > { %v206_v47 = vsel %vm205_vm0, %v202_v24, %v204_v25  ;;  %v209_v52 = vsel %vm205_vm0, 0.0, %v202_v24 }
  0x91   : > { %v223_v56 = vmul.f32 %v219_v43, %v206_v47  ;;  %v222_v60 = vmul.f32 %v215_v49, %v209_v52 }
  0x93   : > { %v235_v27 = vpop.permute.xlu0 %234  ;;  %v231_v3 = vmul.f32 %v228_v21, %v223_v56  ;;  %v230_v7 = vmul.f32 %v228_v21, %v222_v60 }
  0x94   : > { %v302_v26 = vpop.permute.xlu1 %301  ;;  %v242_v58 = vsel %vm238_vm2, 0.0, %v235_v27 }
  0x95   : > { %v249_v4 = vmul.f32 %v247_v23, %v242_v58 }
  0x97   : > { %v254_v29 = vpop.permute.xlu0 %253  ;;  %v251_v16 = vadd.f32 %v249_v4, %v230_v7 }
  0x98   : > { %v237_v28 = vpop.permute.xlu1 %236  ;;  %v261_v54 = vsel %vm257_vm1, 0.0, %v254_v29 }
  0x99   : > { %v239_v53 = vsel %vm238_vm2, %v235_v27, %v237_v28  ;;  %v275_v62 = vmul.f32 %v645_v50, %v261_v54 }
  0x9a   : > { %v250_v61 = vmul.f32 %v247_v23, %v239_v53 }
  0x9b   : > { %v288_v35 = vpop.permute.xlu0 %287  ;;  %v283_v10 = vmul.f32 %v281_v20, %v275_v62 }
  0x9c   : > { %v256_v31 = vpop.permute.xlu1 %255  ;;  %v295_v59 = vsel %vm291_vm3, 0.0, %v288_v35  ;;  %v252_v9 = vadd.f32 %v250_v61, %v231_v3 }
  0x9d   : > { %v258_v48 = vsel %vm257_vm1, %v254_v29, %v256_v31  ;;  %v296_v6 = vmul.f32 %v295_v59, %v215_v49  ;;  %v285_v25 = vadd.f32 %v283_v10, %v251_v16 }
  0x9e   : > { %v276_v57 = vmul.f32 %v642_v44, %v258_v48 }
  0x9f   : > { %v304_v18 = vmul.f32 %v302_v26, %v296_v6 }
  0xa0   : > { %v290_v36 = vpop.permute.xlu1 %289  ;;  %v284_v5 = vmul.f32 %v281_v20, %v276_v57  ;;  %v321_v20 = vcombine.high %v319_v15, %v319_v15 }
  0xa1   : > { %v292_v55 = vsel %vm291_vm3, %v288_v35, %v290_v36  ;;  %v306_v29 = vadd.f32 %v304_v18, %v285_v25 }
  0xa2   : > { %v340_v45 = vpop.permute.xlu0 %339  ;;  %v297_v63 = vmul.f32 %v292_v55, %v219_v43  ;;  %v286_v17 = vadd.f32 %v284_v5, %v252_v9 }
  0xa3   : > { %v323_v37 = vadd.f32 %v319_v15, %v306_v29 }
  0xa4   : > { %v637_v41 = vpop.permute.xlu1 %360  ;;  %v305_v11 = vmul.f32 %v302_v26, %v297_v63 }
  0xa6   : > { %v328_v0 = vpop.permute.xlu0 %327  ;;  %v307_v23 = vadd.f32 %v305_v11, %v286_v17 }
  0xa7   : > { %v333_v13 = vsel %vm329_vm4, %v328_v0, 0.0 }
  0xa8   : > { %v326_v51 = vpop.permute.xlu1 %325  ;;  %v335_v27 = vmul.f32 %v333_v13, %v642_v44  ;;  %v324_v8 = vadd.f32 %v321_v20, %v307_v23 }
  0xa9   : > { %v330_v14 = vsel %vm329_vm4, %v326_v51, %v328_v0 }
  0xaa   : > { %v347_v19 = vpop.permute.xlu0 %346  ;;  %v334_v21 = vmul.f32 %v330_v14, %v645_v50  ;;  %v343_v33 = vmul.f32 %v340_v45, %v335_v27 }
  0xac   : > { %v380_v1 = vpop.permute.xlu1 %379  ;;  %v342_v34 = vmul.f32 %v340_v45, %v334_v21  ;;  %v345_v40 = vadd.f32 %v343_v33, %v324_v8 }
  0xae   : > { %v401_v30 = vpop.permute.xlu0 %400  ;;  %v344_v42 = vadd.f32 %v342_v34, %v323_v37 }
  0xb0   : > { %v349_v12 = vpop.permute.xlu1 %348 }
  0xb1   : > { %v351_v22 = vsel %vm350_vm5, %v347_v19, %v349_v12  ;;  %v354_v24 = vsel %vm350_vm5, %v349_v12, 0.0 }
  0xb2   : > { %v355_v31 = vmul.f32 %v351_v22, %v215_v49  ;;  %v356_v32 = vmul.f32 %v354_v24, %v219_v43  ;;  %v387_v46 = vpop.permute.xlu0 %386 }
  0xb4   : > { %v368_v28 = vpop.permute.xlu1 %367  ;;  %v363_v38 = vmul.f32 %v637_v41, %v355_v31  ;;  %v364_v39 = vmul.f32 %v637_v41, %v356_v32 }
  0xb6   : > { %v365_v53 = vadd.f32 %v363_v38, %v344_v42  ;;  %v366_v54 = vadd.f32 %v364_v39, %v345_v40  ;;  %v411_v58 = vpop.permute.xlu0 %410 }
  0xb8   : > { %v370_v26 = vpop.permute.xlu1 %369 }
  0xb9   : > { %v372_v35 = vsel %vm371_vm6, %v368_v28, %v370_v26  ;;  %v375_v36 = vsel %vm371_vm6, %v370_v26, 0.0 }
  0xba   : > { %v382_v47 = vmul.f32 %v380_v1, %v372_v35  ;;  %v383_v48 = vmul.f32 %v380_v1, %v375_v36 }
  0xbc   : > { %v389_v51 = vpop.permute.xlu1 %388  ;;  %v384_v56 = vadd.f32 %v382_v47, %v365_v53  ;;  %v385_v57 = vadd.f32 %v383_v48, %v366_v54 }
  0xbd   : > { %v391_v43 = vsel %vm390_vm7, %v387_v46, %v389_v51  ;;  %v394_v49 = vsel %vm390_vm7, %v389_v51, 0.0 }
  0xbe   : > { %v395_v45 = vmul.f32 %v391_v43, %v645_v50  ;;  %v396_v52 = vmul.f32 %v394_v49, %v642_v44 }
  0xc0   : > { %v404_v55 = vmul.f32 %v401_v30, %v396_v52  ;;  %v403_v41 = vmul.f32 %v401_v30, %v395_v45 }
  0xc2   : > { %v405_v59 = vadd.f32 %v403_v41, %v384_v56  ;;  %v406_v60 = vadd.f32 %v404_v55, %v385_v57 }
  0xc4   : > { %v413_v61 = vadd.f32 %v411_v58, %v405_v59  ;;  %v414_v62 = vadd.f32 %v411_v58, %v406_v60 }
  0xc6   : > { %v417_v63 = vcombine.low %v413_v61, %v414_v62 }
  0xc8   : > { %419 = vst [vmem:[%s197_s30] sm:$0xff] %v417_v63 }
  0xc9 PF: > { %s14_s15 = sadd.s32 1, %s532_s15  }
  0xca   : > { %p11_p4 = scmp.ge.s32.totalorder %s14_s15, 4  }
  0xcc   :  { %13 = sbr.rel (!%p11_p4) target bundleno = 1 (0x1), region = 67 }

// kernel: self_dwconv_forward.2
= control target key start
LH: loop header
LB: loop body
LE: loop exit
PB: predicated region body
PF: predicated region fallthrough
CT: control target
= control target key end

     0   :  { %s899_s24 = smov 0   ;;  %s901_s25 = smov 0   ;;  %s1008_s0 = inlined_call_operand.vmem [shape: f32[2,4,256], index: 0, kind: input, shape index: {}]   ;;  %s1009_s1 = inlined_call_operand.vmem [shape: f32[1,256], index: 1, kind: input, shape index: {}]   ;;  %s1010_s2 = inlined_call_operand.vmem [shape: f32[1,256], index: 2, kind: input, shape index: {}]   ;;  %s1011_s3 = inlined_call_operand.vmem [shape: bf16[256,32], index: 3, kind: input, shape index: {}]   ;;  %s1012_s4 = inlined_call_operand.vmem [shape: f32[1,32], index: 4, kind: input, shape index: {}]   ;;  %s1013_s5 = inlined_call_operand.vmem [shape: bf16[32,128], index: 5, kind: input, shape index: {}]   ;;  %s1014_s6 = inlined_call_operand.vmem [shape: f32[1,128], index: 6, kind: input, shape index: {}]   ;;  %s1015_s7 = inlined_call_operand.vmem [shape: f32[4,128], index: 7, kind: output, shape index: {}]  }
   0x1   :  { %s903_s26 = smov 0  }
   0x2 LB: > { %s26_s27 = sadd.s32 1, %s849_s25  ;;  %p717_p0 = scmp.ge.s32.totalorder %s853_s26, 1  ;;  %s853_s26 = sphi %s903_s26, %s17_s26   ;;  %s849_s25 = sphi %s901_s25, %s1017_s25   ;;  %s845_s24 = sphi %s899_s24, %s1016_s24  }
   0x3   : > { %p27_p1 = scmp.ge.s32.totalorder %s26_s27, 2  ;;  %p255_p2 = scmp.lt.s32.totalorder %s853_s26, 3 }
   0x5   : > { %s1019_s27 = smov (%p27_p1, %s26_s27), 0  ;;  %p256_p3 = pnand %p717_p0, %p255_p2 }
   0x6   : > { %p290_p4 = scmp.lt.s32.totalorder (!%p256_p3), %s845_s24, 1  ;;  %p720_p5 = scmp.ne.s32.totalorder (!%p256_p3), %s845_s24, 0 }
   0x7   : > { %259 = sbr.rel (%p256_p3) target bundleno = 826 (0x33a), region = 48 }
   0xe   : > { %s291_s28 = scalar_select %p290_p4, %s845_s24, 1 }
   0xf   : > { %307 = sbr.rel (%p720_p5) target bundleno = 22 (0x16), region = 52  ;;  %v855_v0 = vmov (!%p720_p5), 0.0  }
  0x10   : > { %s746_s29 = sshll.u32 %s291_s28, 3  ;;  %308 = vst [vmem:[#allocation2] sm:$0xf] (!%p720_p5), %v855_v0 }
  0x11   : > { %s298_s9 = scalar_lea.vmem %s1008_s0, %s746_s29 }
  0x16 PF: > { %v309_v1 = vld [vmem:[%s298_s9] sm:$0xff]  ;;  %vm313_vm0 = vcmask 1043456   ;;  %v856_v8 = vmov 839922192   ;;  %v325_v10 = vlaneseq  ;;  %v811_v23 = vld [vmem:[%s1011_s3 + $0x48] sm:$0xff]   ;;  %v813_v25 = vld [vmem:[%s1011_s3 + $0x50] sm:$0xff]  }
  0x17   : > { %v311_v2 = vcombine.high %v309_v1, %v309_v1  ;;  %v314_v3 = vsel %vm313_vm0, %v309_v1, 0.0  ;;  %v809_v6 = vld [vmem:[%s1011_s3 + $0x40] sm:$0xff]   ;;  %v323_v9 = vunpack.c.l.s4 %v856_v8  ;;  %v812_v24 = vld [vmem:[%s1011_s3 + $0x8] sm:$0xff]   ;;  %v814_v26 = vld [vmem:[%s1011_s3 + $0x10] sm:$0xff]   ;;  %v857_v59 = vmov 0.0   ;;  %p742_p6 = scmp.ne.s32.totalorder %s845_s24, 1 }
  0x18   : > { %v810_v7 = vld [vmem:[%s1011_s3] sm:$0xff]   ;;  %747 = vmatprep.subr.bf16.mxu0 %v809_v6  ;;  %v326_v12 = vshrl.u32 %v325_v10, 7  ;;  %v815_v27 = vld [vmem:[%s1011_s3 + $0x58] sm:$0xff]   ;;  %v819_v31 = vld [vmem:[%s1011_s3 + $0x68] sm:$0xff]   ;;  %772 = vmatprep.subr.bf16.mxu1 %v857_v59  ;;  %vm858_vm1 = vmmov 0   ;;  %vm592_vm2 = vcmask 261120  }
  0x19   : > { %v315_v4 = vsel %vm313_vm0, %v311_v2, 0.0  ;;  %748 = vmatpush3.bf16.msra.mxu0 %v810_v7  ;;  %v324_v11 = vunpack.c.0.s8 %v323_v9  ;;  %v816_v28 = vld [vmem:[%s1011_s3 + $0x18] sm:$0xff]   ;;  %v817_v29 = vld [vmem:[%s1011_s3 + $0x60] sm:$0xff]   ;;  %v820_v32 = vld [vmem:[%s1011_s3 + $0x28] sm:$0xff]   ;;  %776 = vmatprep.mubr.msk.bf16.mxu1 %vm858_vm1, %v857_v59 }
  0x1a   : > { %v316_v5 = vadd.f32 %v315_v4, %v314_v3  ;;  %749 = vmatprep.subr.bf16.mxu0 %v811_v23  ;;  %v818_v30 = vld [vmem:[%s1011_s3 + $0x20] sm:$0xff]   ;;  %v821_v33 = vld [vmem:[%s1011_s3 + $0x70] sm:$0xff]   ;;  %v823_v35 = vld [vmem:[%s1011_s3 + $0x78] sm:$0xff]   ;;  %v357_v40 = vsub.s32 0, %v326_v12  ;;  %v361_v41 = vsub.s32 1, %v326_v12 }
  0x1b   : > { %v327_v13 = vsub.s32 %v324_v11, %v326_v12  ;;  %v822_v34 = vld [vmem:[%s1011_s3 + $0x30] sm:$0xff]   ;;  %v824_v36 = vld [vmem:[%s1011_s3 + $0x38] sm:$0xff]   ;;  %v353_v42 = vld [vmem:[%s1009_s1] sm:$0x3] }
  0x1c   : > { %317 = vadd.xlane.f32.xlu0 %v316_v5  ;;  %v366_v43 = vld [vmem:[%s1010_s2] sm:$0x3]  ;;  %v358_v44 = vrot.slane %v353_v42, %v357_v40  ;;  %v362_v45 = vrot.slane %v353_v42, %v361_v41  ;;  %v826_v60 = vld [vmem:[%s1013_s5 + $0x8] sm:$0xff]  }
  0x1d   : > { %750 = vmatpush3.bf16.msra.mxu0 %v812_v24  ;;  %v371_v46 = vrot.slane %v366_v43, %v357_v40  ;;  %v375_v47 = vrot.slane %v366_v43, %v361_v41  ;;  %v825_v58 = vld [vmem:[%s1013_s5] sm:$0xff]  }
  0x1e   : > { %751 = vmatprep.subr.bf16.mxu0 %v813_v25  ;;  %v363_v50 = vcombine.low %v358_v44, %v362_v45  ;;  %773 = vmatpush3.bf16.msra.mxu1 %v825_v58  ;;  %v721_v62 = vld [vmem:[%s1012_s4] ss:$0 sm:$0xff] }
  0x1f   : > { %v376_v52 = vcombine.low %v371_v46, %v375_v47  ;;  %774 = vmatprep.subr.bf16.mxu1 %v857_v59 }
  0x21   : > { %752 = vmatpush3.bf16.msra.mxu0 %v814_v26 }
  0x22   : > { %753 = vmatprep.subr.bf16.mxu0 %v815_v27  ;;  %775 = vmatpush3.bf16.msra.mxu1 %v826_v60 }
  0x25   : > { %754 = vmatpush3.bf16.msra.mxu0 %v816_v28 }
  0x26   : > { %755 = vmatprep.subr.bf16.mxu0 %v817_v29 }
  0x29   : > { %756 = vmatpush3.bf16.msra.mxu0 %v818_v30 }
  0x2a   : > { %757 = vmatprep.subr.bf16.mxu0 %v819_v31 }
  0x2d   : > { %758 = vmatpush3.bf16.msra.mxu0 %v820_v32 }
  0x2e   : > { %759 = vmatprep.subr.bf16.mxu0 %v821_v33 }
  0x31   : > { %760 = vmatpush3.bf16.msra.mxu0 %v822_v34 }
  0x32   : > { %761 = vmatprep.subr.bf16.mxu0 %v823_v35 }
  0x35   : > { %762 = vmatpush3.bf16.msra.mxu0 %v824_v36 }
  0xa9   : > { %v318_v14 = vpop.xlane.xlu0 %317 }
  0xaa   : > { %v320_v15 = vmul.f32 0.00390625, %v318_v14  ;;  %v738_v14 = vld [vmem:[%s1014_s6] ss:$0 sm:$0xff] }
  0xac   : > { %v328_v16 = vrot.slane %v320_v15, %v327_v13 }
  0xae   : > { %v330_v17 = vsub.f32 %v309_v1, %v328_v16  ;;  %v636_v16 = vld [vmem:[#allocation2] sm:$0xf] }
  0xb0   : > { %v331_v18 = vmul.f32 %v330_v17, %v330_v17 }
  0xb2   : > { %v333_v19 = vcombine.high %v331_v18, %v331_v18  ;;  %v335_v20 = vsel %vm313_vm0, %v331_v18, 0.0 }
  0xb4   : > { %v336_v21 = vsel %vm313_vm0, %v333_v19, 0.0 }
  0xb5   : > { %v337_v22 = vadd.f32 %v336_v21, %v335_v20 }
  0xb7   : > { %338 = vadd.xlane.f32.xlu0 %v337_v22 }
 0x144   : > { %v339_v37 = vpop.xlane.xlu0 %338 }
 0x145   : > { %v340_v38 = vmul.f32 0.00390625, %v339_v37 }
 0x147   : > { %v341_v39 = vadd.f32 1e-05, %v340_v38 }
 0x149   : > { %827 = vrsqrt.f32 %v341_v39 }
 0x153   : > { %v828_v48 = vpop.eup %827 }
 0x154   : > { %v350_v49 = vrot.slane %v828_v48, %v327_v13 }
 0x156   : > { %v352_v51 = vmul.f32 %v350_v49, %v330_v17 }
 0x158   : > { %v365_v53 = vmul.f32 %v363_v50, %v352_v51 }
 0x15a   : > { %v378_v54 = vadd.f32 %v376_v52, %v365_v53 }
 0x15c   : > { %v380_v55 = vcombine.high %v378_v54, %v378_v54  ;;  %v382_v57 = vpack.c.bf16 %v378_v54, %v378_v54 }
 0x15e   : > { %v383_v56 = vpack.c.bf16 %v380_v55, %v380_v55 }
 0x160   : > { %551 = vmatprep.mubr.bf16.mxu0 %v383_v56 }
 0x161   : > { %552 = vmatmul.mubr.bf16.vlgmr.msra.gmra.mrb[0].mxu0 %v382_v57 }
 0x234   : > { %v763_v61 = vpop.f32.mrb[0].mxu0 }
 0x235   : > { %v764_v63 = vpop.f32.mrb[1].mxu0 }
 0x236   : > { %v765_v0 = vadd.f32 %v764_v63, %v763_v61  ;;  %v766_v1 = vpop.f32.mrb[2].mxu0 }
 0x237   : > { %v767_v2 = vpop.f32.mrb[3].mxu0 }
 0x238   : > { %v554_v3 = vadd.f32 %v765_v0, %v721_v62 }
 0x23a   : > { %v559_v4 = vmul.f32 %v554_v3, %v554_v3 }
 0x23c   : > { %v560_v5 = vmul.f32 %v559_v4, %v554_v3 }
 0x23e   : > { %v561_v6 = vmul.f32 0.044715, %v560_v5 }
 0x240   : > { %v562_v7 = vadd.f32 %v561_v6, %v554_v3 }
 0x242   : > { %v563_v8 = vmul.f32 0.7978846, %v562_v7 }
 0x244   : > { %829 = vtanh.f32 %v563_v8 }
 0x24e   : > { %v830_v9 = vpop.eup %829 }
 0x24f   : > { %v565_v10 = vadd.f32 1.0, %v830_v9 }
 0x251   : > { %v566_v11 = vmul.f32 0.5, %v565_v10 }
 0x253   : > { %v567_v12 = vmul.f32 %v566_v11, %v554_v3 }
 0x255   : > { %v568_v13 = vpack.c.bf16 %v567_v12, %v567_v12 }
 0x257   : > { %777 = vmatmul.mubr.msk.bf16.vlgmr.msra.gmra.mrb[0].mxu1 %vm592_vm2, %v568_v13 }
 0x329   : > { %642 = sbr.rel (%p742_p6) target bundleno = 826 (0x33a), region = 56 }
 0x32a   : > { %v630_v15 = vpop.f32.mrb[0].mxu1 }
 0x32b   : > { %v631_v17 = vadd.f32 %v738_v14, %v630_v15  ;;  %v778_v18 = vpop.f32.mrb[1].mxu1 }
 0x32c   : > { %v633_v19 = vpop.f32.mrb[2].mxu1 }
 0x32d   : > { %v637_v20 = vadd.f32 %v636_v16, %v631_v17  ;;  %v779_v21 = vpop.f32.mrb[3].mxu1 }
 0x32f   : > { %638 = vst [vmem:[#allocation2] sm:$0xf] %v637_v20 }
 0x336   : > { %v643_v22 = vld [vmem:[#allocation2] sm:$0xf] }
 0x337   : > { %v644_v23 = vmul.f32 0.5, %v643_v22 }
 0x339   : > { %645 = vst [vmem:[%s1015_s7] sm:$0xf] %v644_v23 }
 0x33a PF: > { %s17_s26 = sadd.s32 1, %s853_s26   ;;  %s1016_s24 = smov %s849_s25 }
 0x33b   : > { %p14_p7 = scmp.ge.s32.totalorder %s17_s26, 4   ;;  %s1017_s25 = smov %s1019_s27 }
 0x33d   :  { %16 = sbr.rel (!%p14_p7) target bundleno = 2 (0x2), region = 86 }

</bundles_post_ra>
